<compile_context>
chip_gen: v7x
topology: tpu7x:2x2x1
jax: 0.10.0
libtpu: 0.0.40
codegen_flags: <defaults>
</compile_context>

<pallas_src>
import numpy as np
import jax
import jax.numpy as jnp
from jax.experimental import pallas as pl
from jax.experimental.pallas import tpu as pltpu


def lconv_kernel(xk_ref, xres_ref, lt_ref, w_ref, o_ref, acc_ref):
    """One grid step: output tile j, generator k, contraction tile f.

    xk_ref:   (M, TK)  VMEM  x slice over the contraction axis (block f)
    xres_ref: (M, TN)  VMEM  x slice over the output axis (block j), residual
    lt_ref:   (TK, TN) VMEM  transposed generator tile Lt[k, f-tile, j-tile] (bf16)
    w_ref:    (num_L,) SMEM  Wi[k, 0, 0] scalars
    o_ref:    (M, TN)  VMEM  output tile (resident across the k, f axes)
    acc_ref:  (M, TN)  VMEM  f32 accumulator scratch
    """
    k = pl.program_id(1)
    f = pl.program_id(2)
    last_k = pl.num_programs(1) - 1
    last_f = pl.num_programs(2) - 1

    # Residual (+x): initialise the accumulator exactly once per output tile.
    @pl.when(jnp.logical_and(k == 0, f == 0))
    def _():
        acc_ref[...] = xres_ref[...]

    # acc[m, n] += Wi[k] * sum_f x[m, f] * Lt[k, f, n]
    # (MXU matmul with a non-transposed RHS; bf16 L stream, f32 accumulate.)
    xl = jnp.dot(
        xk_ref[...],
        lt_ref[...].astype(jnp.float32),
        preferred_element_type=jnp.float32,
    )
    acc_ref[...] += w_ref[k] * xl

    # Single lane-dense store of the finished output tile.
    @pl.when(jnp.logical_and(k == last_k, f == last_f))
    def _():
        o_ref[...] = acc_ref[...]


def _round_up(n, m):
    return ((n + m - 1) // m) * m


def _pick_tile(d_pad, cap=512):
    """Largest tile <= cap that divides d_pad (d_pad is a multiple of 128)."""
    for t in (512, 256, 128):
        if t <= cap and d_pad % t == 0:
            return t
    return d_pad  # unreachable: d_pad is always a multiple of 128


def _l_blockspec(block_shape, index_map, depth):
    """L-stream BlockSpec; request `depth`-deep buffering when supported."""
    if depth is not None:
        try:
            return pl.BlockSpec(block_shape, index_map,
                                pipeline_mode=pl.Buffered(depth))
        except (AttributeError, TypeError):
            pass
    return pl.BlockSpec(block_shape, index_map)


def lconv_net_forward(x, L, Wi, shape, *, l_dtype=jnp.bfloat16):
    """LconvNet.forward.  x: (B, C, *shape) float32; C must equal cin (=1)."""
    B, C = x.shape[0], x.shape[1]
    d = int(np.prod(shape))
    num_L = L.shape[0]
    # The module fixes cin = cout = 1 (channel mixing with cin/cout > 1 is not needed).
    assert C == 1 and Wi.shape == (num_L, 1, 1), "module uses cin=cout=1"
    M = B * C

    # ---- one-time wrapper-side layout glue ----
    d_pad = _round_up(d, 128)   # lane-dense last dim
    M_pad = _round_up(M, 8)     # sublane-aligned row axis
    TN = _pick_tile(d_pad)      # output-d tile
    TK = _pick_tile(d_pad)      # contraction-f tile

    xm = x.reshape(M, d).astype(jnp.float32)
    if (M_pad, d_pad) != (M, d):
        xm = jnp.zeros((M_pad, d_pad), jnp.float32).at[:M, :d].set(xm)

    # Transposed L (Lt[k, f, n] = L[k, n, f]) so the MXU needs no per-tile
    # transpose; zero-pad to d_pad; stream in bf16 to halve HBM bytes.
    lt = jnp.swapaxes(L.astype(jnp.float32), 1, 2)
    if d_pad != d:
        lt = jnp.zeros((num_L, d_pad, d_pad), jnp.float32).at[:, :d, :d].set(lt)
    lt = lt.astype(l_dtype)

    w = Wi.reshape(num_L).astype(jnp.float32)

    grid = (d_pad // TN, num_L, d_pad // TK)

    def run(l_buffer_depth):
        return pl.pallas_call(
            lconv_kernel,
            out_shape=jax.ShapeDtypeStruct((M_pad, d_pad), jnp.float32),
            grid_spec=pltpu.PrefetchScalarGridSpec(
                num_scalar_prefetch=0,
                grid=grid,
                in_specs=[
                    # x, contraction slice (varies with f)
                    pl.BlockSpec((M_pad, TK), lambda j, k, f: (0, f)),
                    # x, residual slice (varies with j)
                    pl.BlockSpec((M_pad, TN), lambda j, k, f: (0, j)),
                    # Lt[k] tile: the dominant HBM stream -> deeper pipeline
                    _l_blockspec((None, TK, TN), lambda j, k, f: (k, f, j),
                                 l_buffer_depth),
                    # Wi scalars
                    pl.BlockSpec(memory_space=pltpu.MemorySpace.SMEM),
                ],
                out_specs=pl.BlockSpec((M_pad, TN), lambda j, k, f: (0, j)),
                scratch_shapes=[pltpu.VMEM((M_pad, TN), jnp.float32)],
            ),
            compiler_params=pltpu.CompilerParams(
                # output-d axis parallel (2-TC sharding on v7x); reductions last.
                dimension_semantics=("parallel", "arbitrary", "arbitrary"),
            ),
        )(xm, xm, lt, w)

    try:
        y = run(3)          # 3 in-flight L tiles: kernel is DMA-bound on L
    except Exception:       # fall back to default double-buffering if rejected
        y = run(None)

    # Glue: drop padding, Reshape(shape)
    return y[:M, :d].reshape(B, C, *shape)


def init_params(key, shape, num_L=1, cin=1, cout=1):
    """Deterministic kaiming_normal_-style init matching the PyTorch shapes."""
    d = int(np.prod(shape))
    k_l, k_w = jax.random.split(key)
    # kaiming_normal_ (fan_in, gain=sqrt(2)):
    #   L  (num_L, d, d):      fan_in = d*d   -> std = sqrt(2)/d
    #   Wi (num_L, cout, cin): fan_in = cin*1 -> std = sqrt(2/cin)
    L = jax.random.normal(k_l, (num_L, d, d), jnp.float32) * (np.sqrt(2.0) / d)
    Wi = jax.random.normal(k_w, (num_L, cout, cin), jnp.float32) * np.sqrt(2.0 / cin)
    return L, Wi


def reference_forward(x, L, Wi, shape):
    """Pure-JAX reference of the PyTorch forward, for verification."""
    B, C = x.shape[0], x.shape[1]
    d = int(np.prod(shape))
    xf = x.reshape(B, C, d)
    y = jnp.einsum("kdf,bcf,koc->bod", L, xf, Wi) + xf
    return y.reshape(B, C, *shape)


def _check_case(key, shape, B, num_L):
    k_x, k_p = jax.random.split(key)
    C = 1
    x = jax.random.normal(k_x, (B, C, *shape), jnp.float32)
    L, Wi = init_params(k_p, shape, num_L=num_L, cin=C, cout=C)

    out = jax.block_until_ready(lconv_net_forward(x, L, Wi, shape))

    # Against the exact f32 module semantics (L is streamed in bf16 -> loose tol).
    ref = reference_forward(x, L, Wi, shape)
    np.testing.assert_allclose(np.asarray(out), np.asarray(ref),
                               rtol=1e-2, atol=1e-2)

    # Against the bf16-rounded-L reference (what the kernel actually computes).
    L_q = L.astype(jnp.bfloat16).astype(jnp.float32)
    ref_q = reference_forward(x, L_q, Wi, shape)
    np.testing.assert_allclose(np.asarray(out), np.asarray(ref_q),
                               rtol=5e-3, atol=5e-3)


if __name__ == "__main__":
    key = jax.random.PRNGKey(0)
    keys = jax.random.split(key, 3)

    # 1) The LconvNet configuration itself: d = 256, num_L = 1, single tile.
    _check_case(keys[0], shape=(16, 16), B=2, num_L=1)
    # 2) Exercise d-tiling (d = 384 -> 128-tiles) and the num_L reduction axis.
    _check_case(keys[1], shape=(16, 24), B=3, num_L=2)
    # 3) Exercise lane padding (d = 228 -> padded to 256).
    _check_case(keys[2], shape=(12, 19), B=2, num_L=1)

    print("KERNEL_OK")
</pallas_src>

<mosaic_0001>
module attributes {stable_mosaic.version = 11 : i64} {
  func.func @lconv_kernel(%arg0: i32, %arg1: i32, %arg2: i32, %arg3: memref<8x256xf32, #tpu.memory_space<vmem>>, %arg4: memref<8x256xf32, #tpu.memory_space<vmem>>, %arg5: memref<1x256x256xbf16, #tpu.memory_space<vmem>>, %arg6: memref<1xf32, #tpu.memory_space<smem>>, %arg7: memref<8x256xf32, #tpu.memory_space<vmem>>, %arg8: memref<8x256xf32, #tpu.memory_space<vmem>>) attributes {dimension_semantics = [#tpu.dimension_semantics<parallel>, #tpu.dimension_semantics<arbitrary>, #tpu.dimension_semantics<arbitrary>], iteration_bounds = array<i64: 1, 1, 1>, scalar_prefetch = 0 : i64, scratch_operands = 1 : i64, tpu.core_type = #tpu.core_type<tc>, window_params = [{transform_indices = @transform_0, window_bounds = array<i64: 8, 256>}, {transform_indices = @transform_1, window_bounds = array<i64: 8, 256>}, {transform_indices = @transform_2, window_bounds = array<i64: 1, 256, 256>}, {transform_indices = @transform_3, window_bounds = array<i64: 1>}, {transform_indices = @transform_4, window_bounds = array<i64: 8, 256>}]} {
    %c0_i32 = arith.constant 0 : i32
    %0 = arith.cmpi eq, %arg1, %c0_i32 : i32
    %c0_i32_0 = arith.constant 0 : i32
    %1 = arith.cmpi eq, %arg2, %c0_i32_0 : i32
    %2 = arith.andi %0, %1 : i1
    %3 = arith.extui %2 : i1 to i32
    %c0_i32_1 = arith.constant 0 : i32
    %4 = arith.cmpi ne, %3, %c0_i32_1 : i32
    scf.if %4 {
      %c0_13 = arith.constant 0 : index
      %c0_14 = arith.constant 0 : index
      %22 = vector.load %arg4[%c0_13, %c0_14] : memref<8x256xf32, #tpu.memory_space<vmem>>, vector<8x256xf32>
      %c0_15 = arith.constant 0 : index
      %c0_16 = arith.constant 0 : index
      %23 = vector.load %arg8[%c0_15, %c0_16] : memref<8x256xf32, #tpu.memory_space<vmem>>, vector<8x256xf32>
      tpu.vector_store %arg8[%c0_15, %c0_16], %22 {strides = array<i32>} : memref<8x256xf32, #tpu.memory_space<vmem>>, vector<8x256xf32>,
    } else {
    }
    %c0 = arith.constant 0 : index
    %c0_2 = arith.constant 0 : index
    %5 = vector.load %arg3[%c0, %c0_2] : memref<8x256xf32, #tpu.memory_space<vmem>>, vector<8x256xf32>
    %c0_3 = arith.constant 0 : index
    %c0_4 = arith.constant 0 : index
    %c0_5 = arith.constant 0 : index
    %6 = vector.load %arg5[%c0_3, %c0_4, %c0_5] : memref<1x256x256xbf16, #tpu.memory_space<vmem>>, vector<1x256x256xbf16>
    %7 = vector.shape_cast %6 : vector<1x256x256xbf16> to vector<256x256xbf16>
    %8 = arith.extf %7 : vector<256x256xbf16> to vector<256x256xf32>
    %cst = arith.constant dense<0.000000e+00> : vector<8x256xf32>
    %9 = tpu.matmul %5, %8, %cst {dimension_numbers = #tpu.dot_dimension_numbers<[1], [0], [0], [1], [0, 0, 1, 1], [], []>} : vector<8x256xf32>, vector<256x256xf32>, vector<8x256xf32> -> vector<8x256xf32>
    %c0_6 = arith.constant 0 : index
    %c0_7 = arith.constant 0 : index
    %10 = vector.load %arg8[%c0_6, %c0_7] : memref<8x256xf32, #tpu.memory_space<vmem>>, vector<8x256xf32>
    %11 = arith.index_cast %arg1 : i32 to index
    %12 = memref.load %arg6[%11] : memref<1xf32, #tpu.memory_space<smem>>
    %13 = vector.broadcast %12 : f32 to vector<8x256xf32>
    %14 = arith.mulf %13, %9 : vector<8x256xf32>
    %15 = arith.addf %10, %14 : vector<8x256xf32>
    %c0_8 = arith.constant 0 : index
    %c0_9 = arith.constant 0 : index
    %16 = vector.load %arg8[%c0_8, %c0_9] : memref<8x256xf32, #tpu.memory_space<vmem>>, vector<8x256xf32>
    tpu.vector_store %arg8[%c0_8, %c0_9], %15 {strides = array<i32>} : memref<8x256xf32, #tpu.memory_space<vmem>>, vector<8x256xf32>,
    %c0_i32_10 = arith.constant 0 : i32
    %17 = arith.cmpi eq, %arg1, %c0_i32_10 : i32
    %c0_i32_11 = arith.constant 0 : i32
    %18 = arith.cmpi eq, %arg2, %c0_i32_11 : i32
    %19 = arith.andi %17, %18 : i1
    %20 = arith.extui %19 : i1 to i32
    %c0_i32_12 = arith.constant 0 : i32
    %21 = arith.cmpi ne, %20, %c0_i32_12 : i32
    scf.if %21 {
      %c0_13 = arith.constant 0 : index
      %c0_14 = arith.constant 0 : index
      %22 = vector.load %arg8[%c0_13, %c0_14] : memref<8x256xf32, #tpu.memory_space<vmem>>, vector<8x256xf32>
      %c0_15 = arith.constant 0 : index
      %c0_16 = arith.constant 0 : index
      %23 = vector.load %arg7[%c0_15, %c0_16] : memref<8x256xf32, #tpu.memory_space<vmem>>, vector<8x256xf32>
      tpu.vector_store %arg7[%c0_15, %c0_16], %22 {strides = array<i32>} : memref<8x256xf32, #tpu.memory_space<vmem>>, vector<8x256xf32>,
    } else {
    }
    return
  }
  func.func @transform_0(%arg0: i32, %arg1: i32, %arg2: i32) -> (i32, i32) {
    %c0_i32 = arith.constant 0 : i32
    %c0_i32_0 = arith.constant 0 : i32
    return %c0_i32, %arg2 : i32, i32
  }
  func.func @transform_1(%arg0: i32, %arg1: i32, %arg2: i32) -> (i32, i32) {
    %c0_i32 = arith.constant 0 : i32
    %c0_i32_0 = arith.constant 0 : i32
    return %c0_i32, %arg0 : i32, i32
  }
  func.func @transform_2(%arg0: i32, %arg1: i32, %arg2: i32) -> (i32, i32, i32) {
    %c0_i32 = arith.constant 0 : i32
    return %arg1, %arg2, %arg0 : i32, i32, i32
  }
  func.func @transform_3(%arg0: i32, %arg1: i32, %arg2: i32) -> i32 {
    %c0_i32 = arith.constant 0 : i32
    %c0_i32_0 = arith.constant 0 : i32
    return %c0_i32 : i32
  }
  func.func @transform_4(%arg0: i32, %arg1: i32, %arg2: i32) -> (i32, i32) {
    %c0_i32 = arith.constant 0 : i32
    %c0_i32_0 = arith.constant 0 : i32
    return %c0_i32, %arg0 : i32, i32
  }
}

</mosaic_0001>

<bundles_post_ra>
// kernel: tpu_custom_call.1
= control target key start
LH: loop header
LB: loop body
LE: loop exit
PB: predicated region body
PF: predicated region fallthrough
CT: control target
= control target key end

     0   :  { %10 = vsyncpa [#allocation5], 0  ;;  %s593_s0 = inlined_call_operand.hbm [shape: f32[8,256], index: 0, kind: input, shape index: {}]   ;;  %s594_s1 = inlined_call_operand.hbm [shape: f32[8,256], index: 1, kind: input, shape index: {}]   ;;  %s595_s2 = inlined_call_operand.hbm [shape: bf16[1,256,256], index: 2, kind: input, shape index: {}]   ;;  %s596_s3 = inlined_call_operand.<no memory space> [shape: f32[1], index: 3, kind: input, shape index: {}]   ;;  %s597_s4 = inlined_call_operand.hbm [shape: f32[8,256], index: 4, kind: output, shape index: {}]  }
   0x1   :  { %11 = vsyncpa [#allocation8], 0 }
   0x2   :  { %12 = vsyncpa [#allocation6], 0  ;;  %s511_s15 = smov [#allocation7]   ;;  %s512_s17 = smov [#allocation4]  }
   0x3   :  { %s29_s16 = sshll.u32 %s511_s15, 4  ;;  %s19_s18 = sshll.u32 %s512_s17, 4  ;;  %s30_s16 = int_to_ptr.vmem [resolvable:$true] %s29_s16  ;;  %s20_s18 = int_to_ptr.vmem [resolvable:$true] %s19_s18 }
   0x4   :  { %s417_s21 = scalar_lea.hbm %s594_s1, 256 }
   0x5   :  { %p418_p0 = scmp.ne.s32.totalorder %s594_s1, %s417_s21  ;;  %p421_p1 = scmp.lt.u32.totalorder %s417_s21, %s594_s1 }
   0x7   :  { %p423_p2 = pnand %p421_p1, %p418_p0 }
   0x9   :  { %426 = shalt.err (!%p423_p2)
}
   0xa   :  { %s427_s26 = scalar_lea.vmem %s30_s16, 256  ;;  %p432_p4 = scmp.lt.s32.totalorder %s30_s16, %s30_s16 }
   0xb   :  { %p428_p3 = scmp.ne.s32.totalorder %s30_s16, %s427_s26  ;;  %p433_p5 = scmp.lt.s32.totalorder %s427_s26, %s427_s26 }
   0xd   :  { %p434_p6 = por %p433_p5, %p432_p4 }
   0xf   :  { %p435_p7 = pnand %p434_p6, %p428_p3 }
  0x11   :  { %438 = shalt.err (!%p435_p7)
}
  0x12   :  { %32 = dma.hbm_to_vmem [thread:$0]  %s594_s1, 256, %s30_s16, [#allocation8]  }
  0x13   :  { %s439_s5 = scalar_lea.hbm %s593_s0, 256 }
  0x14   :  { %p440_p8 = scmp.ne.s32.totalorder %s593_s0, %s439_s5  ;;  %p443_p9 = scmp.lt.u32.totalorder %s439_s5, %s593_s0 }
  0x16   :  { %p445_p10 = pnand %p443_p9, %p440_p8 }
  0x18   :  { %448 = shalt.err (!%p445_p10)
}
  0x19   :  { %s449_s10 = scalar_lea.vmem %s20_s18, 256  ;;  %p454_p12 = scmp.lt.s32.totalorder %s20_s18, %s20_s18 }
  0x1a   :  { %p450_p11 = scmp.ne.s32.totalorder %s20_s18, %s449_s10  ;;  %p455_p13 = scmp.lt.s32.totalorder %s449_s10, %s449_s10 }
  0x1c   :  { %p456_p0 = por %p455_p13, %p454_p12 }
  0x1e   :  { %p457_p1 = pnand %p456_p0, %p450_p11 }
  0x20   :  { %460 = shalt.err (!%p457_p1)
}
  0x21   :  { %22 = dma.hbm_to_vmem [thread:$0]  %s593_s0, 256, %s20_s18, [#allocation5]  }
  0x22   :  { %s513_s12 = smov [#allocation9]   ;;  %s461_s16 = scalar_lea.hbm %s595_s2, 4096 }
  0x23   :  { %s38_s13 = sshll.u32 %s513_s12, 4  ;;  %p462_p2 = scmp.ne.s32.totalorder %s595_s2, %s461_s16  ;;  %s39_s13 = int_to_ptr.vmem [resolvable:$true] %s38_s13 }
  0x24   :  { %p465_p3 = scmp.lt.u32.totalorder %s461_s16, %s595_s2 }
  0x26   :  { %p467_p4 = pnand %p465_p3, %p462_p2 }
  0x28   :  { %470 = shalt.err (!%p467_p4)
}
  0x29   :  { %s471_s22 = scalar_lea.vmem %s39_s13, 4096  ;;  %p476_p6 = scmp.lt.s32.totalorder %s39_s13, %s39_s13 }
  0x2a   :  { %p472_p5 = scmp.ne.s32.totalorder %s39_s13, %s471_s22  ;;  %p477_p7 = scmp.lt.s32.totalorder %s471_s22, %s471_s22 }
  0x2c   :  { %p478_p8 = por %p477_p7, %p476_p6 }
  0x2e   :  { %p479_p9 = pnand %p478_p8, %p472_p5 }
  0x30   :  { %482 = shalt.err (!%p479_p9)
}
  0x31   :  { %s514_s0 = smov 128   ;;  %s515_s18 = smov 8  }
  0x32   :  { %44 = dma.hbm_to_vmem [thread:$0]  %s595_s2, 4096, %s39_s13, [#allocation8], %s514_s0, %s514_s0, %s515_s18  }
  0x33   :  { %505 = dma.done.wait [#allocation5], 256  }
  0x34   :  { %506 = vsyncadd [#allocation5], 4294967040 }
  0x35   :  { %507 = dma.done.wait [#allocation8], 4352  }
  0x36   :  { %508 = vsyncadd [#allocation8], 4294962944  ;;  %v369_v0 = vld [vmem:[#allocation9 + $0x4] ss:$8 sps:$4 sm:$0xff]   ;;  %v371_v1 = vld [vmem:[#allocation9] ss:$8 sps:$4 sm:$0xff]   ;;  %v238_v34 = vstv %s596_s3 }
  0x37   :  { %268 = vmatprep.subr.bf16.mxu0 %v369_v0  ;;  %v372_v2 = vld [vmem:[#allocation9 + $0x14] ss:$8 sps:$4 sm:$0xff]   ;;  %v374_v3 = vld [vmem:[#allocation9 + $0x10] ss:$8 sps:$4 sm:$0xff]   ;;  %v375_v4 = vld [vmem:[#allocation9 + $0x24] ss:$8 sps:$4 sm:$0xff]  }
  0x38   :  { %270 = vmatpush1.bf16.msra.mxu0 %v371_v1  ;;  %v377_v5 = vld [vmem:[#allocation9 + $0x20] ss:$8 sps:$4 sm:$0xff]   ;;  %v378_v6 = vld [vmem:[#allocation9 + $0x34] ss:$8 sps:$4 sm:$0xff]   ;;  %v380_v7 = vld [vmem:[#allocation9 + $0x30] ss:$8 sps:$4 sm:$0xff]  }
  0x39   :  { %272 = vmatprep.subr.bf16.mxu0 %v372_v2  ;;  %v381_v8 = vld [vmem:[#allocation9 + $0x44] ss:$8 sps:$4 sm:$0xff]   ;;  %v383_v9 = vld [vmem:[#allocation9 + $0x40] ss:$8 sps:$4 sm:$0xff]   ;;  %v384_v10 = vld [vmem:[#allocation9 + $0x54] ss:$8 sps:$4 sm:$0xff]  }
  0x3a   :  { %v386_v11 = vld [vmem:[#allocation9 + $0x50] ss:$8 sps:$4 sm:$0xff]   ;;  %v387_v12 = vld [vmem:[#allocation9 + $0x64] ss:$8 sps:$4 sm:$0xff]   ;;  %v389_v14 = vld [vmem:[#allocation9 + $0x60] ss:$8 sps:$4 sm:$0xff]  }
  0x3b   :  { %v67_v13 = vld [vmem:[#allocation4 + $0x8] sm:$0xff]  ;;  %v390_v15 = vld [vmem:[#allocation9 + $0x74] ss:$8 sps:$4 sm:$0xff]   ;;  %v392_v16 = vld [vmem:[#allocation9 + $0x70] ss:$8 sps:$4 sm:$0xff]   ;;  %s516_s26 = smov [#allocation10]  }
  0x3c   :  { %274 = vmatpush1.bf16.msra.mxu0 %v374_v3  ;;  %228 = vmatprep.mubr.f32.mxu0 %v67_v13  ;;  %v393_v17 = vld [vmem:[#allocation9 + $0x84] ss:$8 sps:$4 sm:$0xff]   ;;  %v395_v18 = vld [vmem:[#allocation9 + $0x80] ss:$8 sps:$4 sm:$0xff]   ;;  %v396_v19 = vld [vmem:[#allocation9 + $0x94] ss:$8 sps:$4 sm:$0xff]  }
  0x3d   :  { %276 = vmatprep.subr.bf16.mxu0 %v375_v4  ;;  %v398_v20 = vld [vmem:[#allocation9 + $0x90] ss:$8 sps:$4 sm:$0xff]   ;;  %v399_v21 = vld [vmem:[#allocation9 + $0xa4] ss:$8 sps:$4 sm:$0xff]   ;;  %v401_v22 = vld [vmem:[#allocation9 + $0xa0] ss:$8 sps:$4 sm:$0xff]  }
  0x3e   :  { %v402_v23 = vld [vmem:[#allocation9 + $0xb4] ss:$8 sps:$4 sm:$0xff]   ;;  %v404_v24 = vld [vmem:[#allocation9 + $0xb0] ss:$8 sps:$4 sm:$0xff]   ;;  %v405_v25 = vld [vmem:[#allocation9 + $0xc4] ss:$8 sps:$4 sm:$0xff]  }
  0x3f   :  { %v407_v26 = vld [vmem:[#allocation9 + $0xc0] ss:$8 sps:$4 sm:$0xff]   ;;  %v408_v27 = vld [vmem:[#allocation9 + $0xd4] ss:$8 sps:$4 sm:$0xff]   ;;  %v410_v28 = vld [vmem:[#allocation9 + $0xd0] ss:$8 sps:$4 sm:$0xff]  }
  0x40   :  { %278 = vmatpush1.bf16.msra.mxu0 %v377_v5  ;;  %v411_v29 = vld [vmem:[#allocation9 + $0xe4] ss:$8 sps:$4 sm:$0xff]   ;;  %v413_v30 = vld [vmem:[#allocation9 + $0xe0] ss:$8 sps:$4 sm:$0xff]   ;;  %v414_v31 = vld [vmem:[#allocation9 + $0xf4] ss:$8 sps:$4 sm:$0xff]  }
  0x41   :  { %280 = vmatprep.subr.bf16.mxu0 %v378_v6  ;;  %v416_v32 = vld [vmem:[#allocation9 + $0xf0] ss:$8 sps:$4 sm:$0xff]   ;;  %v66_v33 = vld [vmem:[#allocation4] sm:$0xff]  ;;  %s257_s27 = sshll.u32 %s516_s26, 4  ;;  %s258_s27 = int_to_ptr.vmem [resolvable:$true] %s257_s27 }
  0x42   :  { %v62_v35 = vld [vmem:[#allocation7] sm:$0xff]  ;;  %v63_v38 = vld [vmem:[#allocation7 + $0x8] sm:$0xff]  ;;  %s483_s28 = scalar_lea.vmem %s258_s27, 256  ;;  %p488_p11 = scmp.lt.s32.totalorder %s258_s27, %s258_s27 }
  0x43   :  { %p484_p10 = scmp.ne.s32.totalorder %s258_s27, %s483_s28  ;;  %p489_p12 = scmp.lt.s32.totalorder %s483_s28, %s483_s28 }
  0x44   :  { %282 = vmatpush1.bf16.msra.mxu0 %v380_v7 }
  0x45   :  { %284 = vmatprep.subr.bf16.mxu0 %v381_v8  ;;  %p490_p13 = por %p489_p12, %p488_p11 }
  0x47   :  { %p491_p0 = pnand %p490_p13, %p484_p10 }
  0x48   :  { %286 = vmatpush1.bf16.msra.mxu0 %v383_v9 }
  0x49   :  { %288 = vmatprep.subr.bf16.mxu0 %v384_v10 }
  0x4c   :  { %290 = vmatpush1.bf16.msra.mxu0 %v386_v11 }
  0x4d   :  { %292 = vmatprep.subr.bf16.mxu0 %v387_v12 }
  0x50   :  { %294 = vmatpush1.bf16.msra.mxu0 %v389_v14 }
  0x51   :  { %296 = vmatprep.subr.bf16.mxu0 %v390_v15 }
  0x54   :  { %298 = vmatpush1.bf16.msra.mxu0 %v392_v16 }
  0x55   :  { %300 = vmatprep.subr.bf16.mxu0 %v393_v17 }
  0x58   :  { %302 = vmatpush1.bf16.msra.mxu0 %v395_v18 }
  0x59   :  { %304 = vmatprep.subr.bf16.mxu0 %v396_v19 }
  0x5c   :  { %306 = vmatpush1.bf16.msra.mxu0 %v398_v20 }
  0x5d   :  { %308 = vmatprep.subr.bf16.mxu0 %v399_v21 }
  0x60   :  { %310 = vmatpush1.bf16.msra.mxu0 %v401_v22 }
  0x61   :  { %312 = vmatprep.subr.bf16.mxu0 %v402_v23 }
  0x64   :  { %314 = vmatpush1.bf16.msra.mxu0 %v404_v24 }
  0x65   :  { %316 = vmatprep.subr.bf16.mxu0 %v405_v25 }
  0x68   :  { %318 = vmatpush1.bf16.msra.mxu0 %v407_v26 }
  0x69   :  { %320 = vmatprep.subr.bf16.mxu0 %v408_v27 }
  0x6c   :  { %322 = vmatpush1.bf16.msra.mxu0 %v410_v28 }
  0x6d   :  { %324 = vmatprep.subr.bf16.mxu0 %v411_v29 }
  0x70   :  { %326 = vmatpush1.bf16.msra.mxu0 %v413_v30 }
  0x71   :  { %328 = vmatprep.subr.bf16.mxu0 %v414_v31 }
  0x74   :  { %330 = vmatpush1.bf16.msra.mxu0 %v416_v32 }
  0x77   :  { %229 = vmatmul.mubr.f32.vlgmr.msra.gmra.mrb[0].mxu0 %v66_v33 }
 0x14a   :  { %v230_v36 = vpop.f32.mrb[0].mxu0 }
 0x14b   :  { %v239_v37 = vmul.f32 %v238_v34, %v230_v36  ;;  %v232_v39 = vpop.f32.mrb[1].mxu0 }
 0x14c   :  { %v240_v40 = vmul.f32 %v238_v34, %v232_v39 }
 0x14d   :  { %v241_v41 = vadd.f32 %v239_v37, %v62_v35 }
 0x14e   :  { %v242_v42 = vadd.f32 %v240_v40, %v63_v38 }
 0x14f   :  { %249 = vst [vmem:[#allocation10] sm:$0xff] %v241_v41 }
 0x150   :  { %250 = vst [vmem:[#allocation10 + $0x8] sm:$0xff] %v242_v42 }
 0x151   :  { %494 = shalt.err (!%p491_p0)
}
 0x152   :  { %s495_s30 = scalar_lea.hbm %s597_s4, 256 }
 0x153   :  { %p496_p1 = scmp.ne.s32.totalorder %s597_s4, %s495_s30  ;;  %p499_p2 = scmp.lt.u32.totalorder %s495_s30, %s597_s4 }
 0x155   :  { %p501_p3 = pnand %p499_p2, %p496_p1 }
 0x157   :  { %504 = shalt.err (!%p501_p3)
}
 0x158   :  { %260 = dma.vmem_to_hbm [thread:$0]  %s258_s27, 256, %s597_s4, [#allocation6]  }
 0x159   :  { %509 = dma.done.wait [#allocation6], 256  }
 0x15a   :  { %510 = vsyncadd [#allocation6], 4294967040 }
 0x15b   :  { %264 = vsyncpa [#allocation5], 1 }
 0x15c   :  { %265 = vsyncpa [#allocation8], 1 }
 0x15d   :  { %266 = vsyncpa [#allocation6], 1 }

</bundles_post_ra>
